<compile_context>
chip_gen: v6e
topology: v6e:2x2x1
jax: 0.10.0
libtpu: 0.0.40
codegen_flags: <defaults>
</compile_context>

<pallas_src>
import jax
import jax.numpy as jnp
from jax.experimental import pallas as pl
from jax.experimental.pallas import tpu as pltpu


def _round_up(x, m):
    return (x + m - 1) // m * m


# ----------------------------------------------------------------------------
# Fused kernel: running max-pool over G tiles + MLP head (BN already folded).
# ----------------------------------------------------------------------------
def _make_classifier_kernel(num_hidden):
    """Kernel fusing: running max over G -> [Linear+BN+ReLU]*num_hidden -> Linear."""

    def kernel(x_ref, *refs):
        # refs = (w_h0, b_h0, ..., w_out, b_out, o_ref, pooled_scratch)
        o_ref = refs[-2]
        pooled = refs[-1]
        w_refs = refs[:-2]

        g = pl.program_id(1)

        @pl.when(g == 0)
        def _():
            pooled[...] = jnp.full(pooled.shape, -jnp.inf, dtype=pooled.dtype)

        # Running max over this G tile.  Reduce in the streamed dtype first and
        # cast only the pooled [TB, D] result (no full-tile astype).
        part = jnp.max(x_ref[...], axis=1)                    # [TB, D]
        pooled[...] = jnp.maximum(pooled[...], part.astype(jnp.float32))

        @pl.when(g == pl.num_programs(1) - 1)
        def _():
            h = pooled[...]                                   # [TB, D] f32
            # Hidden stages: Linear + folded-BN + ReLU (Dropout = identity in eval).
            for li in range(num_hidden):
                w = w_refs[2 * li][...]                       # [d_in, d_out]
                b = w_refs[2 * li + 1][...]                   # [1, d_out] (f32)
                h = jnp.dot(h.astype(w.dtype), w,
                            preferred_element_type=jnp.float32) + b.astype(jnp.float32)
                h = jnp.maximum(h, 0.0)
            # Final Linear (no BN / act).
            w_out = w_refs[2 * num_hidden][...]               # [d_last, class_num]
            b_out = w_refs[2 * num_hidden + 1][...]           # [1, class_num] (f32)
            y = jnp.dot(h.astype(w_out.dtype), w_out,
                        preferred_element_type=jnp.float32) + b_out.astype(jnp.float32)
            o_ref[...] = y.astype(o_ref.dtype)

    return kernel


def _choose_tiles(b, g, d, itemsize, tile_b, tile_g):
    """Pick (tile_b, b_pad, tile_g, g_pad): 8-aligned tiles, VMEM-budgeted x block."""
    b8 = _round_up(b, 8)
    if tile_b is None:
        # Multiple of 8, capped at 128, and aiming for >=2 parallel steps when B allows
        # (feeds both v7x TensorCores; neutral on v5e/v6e).
        tile_b = max(8, min(128, 8 * (b8 // 16)))
    else:
        tile_b = min(_round_up(tile_b, 8), b8)
    b_pad = _round_up(b, tile_b)

    g8 = _round_up(g, 8)
    if tile_g is None:
        # Budget: <= ~8 MiB per x buffer -> double-buffered pair <= 16 MiB, which fits
        # v7x's 64 MiB VMEM (and v5e/v6e's 128 MiB) together with weights + scratch.
        budget = 8 * 1024 * 1024
        max_rows = max(8, (budget // max(1, tile_b * d * itemsize)) // 8 * 8)
        tile_g = min(g8, max_rows)
    else:
        tile_g = min(_round_up(tile_g, 8), g8)
    g_pad = _round_up(g, tile_g)
    return tile_b, b_pad, tile_g, g_pad


def classifier_block_forward(x_bdg, hidden_folded, out_folded, *,
                             tile_b=None, tile_g=None, stream_dtype=None):
    """x_bdg: [B, D, G] (PyTorch layout).

    hidden_folded: list of (W [d_in, d_out], b [1, d_out]) with eval-mode BN folded in.
    out_folded:    (W [d_last, class_num], b [1, class_num]).
    stream_dtype:  optional dtype to stream x in (e.g. jnp.bfloat16 halves HBM bytes).
    Returns logits [B, class_num] float32.
    """
    b, d, g = x_bdg.shape
    out_w, out_b = out_folded
    class_num = out_w.shape[1]
    num_hidden = len(hidden_folded)

    x_dtype = jnp.dtype(stream_dtype) if stream_dtype is not None else x_bdg.dtype
    tb, b_pad, tg, g_pad = _choose_tiles(b, g, d, x_dtype.itemsize, tile_b, tile_g)

    # Lane-dense layout: [B, G, D] keeps D on the lane axis (cheap pool, zero relayout
    # into the MXU).  Ideally upstream produces [B, G, D] directly and skips this pass.
    x_bgd = jnp.transpose(x_bdg, (0, 2, 1))
    if stream_dtype is not None:
        x_bgd = x_bgd.astype(stream_dtype)
    if b_pad != b or g_pad != g:
        # -inf padding is invisible to the max; padded batch rows are sliced off below.
        x_bgd = jnp.pad(x_bgd, ((0, b_pad - b), (0, g_pad - g), (0, 0)),
                        constant_values=float("-inf"))

    kernel = _make_classifier_kernel(num_hidden)

    flat_weights = []
    in_specs = [
        # x tile: (TB, TG, D); TG multiple of 8, D full extent -> layout-legal block.
        pl.BlockSpec((tb, tg, d), lambda i, gi: (i, gi, 0)),
    ]
    for (w, bb) in hidden_folded:
        flat_weights += [w, bb]
        in_specs += [
            pl.BlockSpec(w.shape, lambda i, gi: (0, 0)),
            pl.BlockSpec(bb.shape, lambda i, gi: (0, 0)),
        ]
    flat_weights += [out_w, out_b]
    in_specs += [
        pl.BlockSpec(out_w.shape, lambda i, gi: (0, 0)),
        pl.BlockSpec(out_b.shape, lambda i, gi: (0, 0)),
    ]

    # Advisory cost estimate (the call is HBM-bound on streaming x).
    mm_flops, prev = 0, d
    for (w, _) in hidden_folded:
        mm_flops += 2 * b_pad * prev * w.shape[1]
        prev = w.shape[1]
    mm_flops += 2 * b_pad * prev * class_num
    bytes_x = b_pad * g_pad * d * x_dtype.itemsize
    bytes_w = sum(int(w.size) * w.dtype.itemsize + int(bb.size) * bb.dtype.itemsize
                  for (w, bb) in hidden_folded)
    bytes_w += int(out_w.size) * out_w.dtype.itemsize + int(out_b.size) * out_b.dtype.itemsize
    bytes_out = b_pad * class_num * 4
    cost = pl.CostEstimate(flops=int(mm_flops + b_pad * d * g_pad),
                           transcendentals=0,
                           bytes_accessed=int(bytes_x + bytes_w + bytes_out))

    out = pl.pallas_call(
        kernel,
        out_shape=jax.ShapeDtypeStruct((b_pad, class_num), jnp.float32),
        grid_spec=pl.GridSpec(
            grid=(b_pad // tb, g_pad // tg),          # (batch, points-reduction)
            in_specs=in_specs,
            out_specs=pl.BlockSpec((tb, class_num), lambda i, gi: (i, 0)),
            scratch_shapes=[pltpu.VMEM((tb, d), jnp.float32)],   # running-max pool
        ),
        compiler_params=pltpu.CompilerParams(
            dimension_semantics=("parallel", "arbitrary"),
            vmem_limit_bytes=48 * 1024 * 1024,
        ),
        cost_estimate=cost,
    )(x_bgd, *flat_weights)

    return out[:b] if b_pad != b else out


# ----------------------------------------------------------------------------
# Raw parameter construction (mirrors the PyTorch module) + BN folding.
# Folding is hoisted out of the forward path — do it once, reuse every call.
# ----------------------------------------------------------------------------
def _hidden_dims(out_channel):
    if out_channel < 512:
        return [128]
    elif out_channel < 1024:
        return [out_channel // 2]
    else:
        return [out_channel // 2, out_channel // 4]


def build_classifier_raw_params(key, out_channel, class_num):
    """Raw nn.Linear / nn.BatchNorm1d (eval-mode) parameters, PyTorch-style init."""
    dims = [out_channel] + _hidden_dims(out_channel)
    stages = []
    for i in range(len(dims) - 1):
        key, k1, k2, k3, k4, k5, k6 = jax.random.split(key, 7)
        d_in, d_out = dims[i], dims[i + 1]
        bound = 1.0 / jnp.sqrt(jnp.float32(d_in))
        stages.append(dict(
            w=jax.random.uniform(k1, (d_out, d_in), jnp.float32, -bound, bound),
            b=jax.random.uniform(k2, (d_out,), jnp.float32, -bound, bound),
            gamma=1.0 + 0.1 * jax.random.normal(k3, (d_out,), jnp.float32),
            beta=0.1 * jax.random.normal(k4, (d_out,), jnp.float32),
            rmean=0.05 * jax.random.normal(k5, (d_out,), jnp.float32),
            rvar=1.0 + 0.1 * jnp.abs(jax.random.normal(k6, (d_out,), jnp.float32)),
        ))
    key, k1, k2 = jax.random.split(key, 3)
    d_in = dims[-1]
    bound = 1.0 / jnp.sqrt(jnp.float32(d_in))
    out_w = jax.random.uniform(k1, (class_num, d_in), jnp.float32, -bound, bound)
    out_b = jax.random.uniform(k2, (class_num,), jnp.float32, -bound, bound)
    return stages, (out_w, out_b)


def fold_classifier_params(stages, out_linear, eps=1e-5, weight_dtype=jnp.float32):
    """Fold eval-mode BN into each hidden Linear; transpose for row-major matmul.

    weight_dtype=jnp.bfloat16 keeps matrices in the MXU-native dtype (v6e/v7x ~2x
    matmul throughput, half the weight bytes); biases stay f32.
    """
    hidden = []
    for p in stages:
        scale = p["gamma"] / jnp.sqrt(p["rvar"] + eps)                  # [d_out]
        w_f = (p["w"] * scale[:, None]).T.astype(weight_dtype)          # [d_in, d_out]
        b_f = (scale * (p["b"] - p["rmean"]) + p["beta"])[None, :].astype(jnp.float32)
        hidden.append((w_f, b_f))
    out_w, out_b = out_linear
    return hidden, (out_w.T.astype(weight_dtype), out_b[None, :].astype(jnp.float32))


# ----------------------------------------------------------------------------
# Pure-JAX reference (raw params, explicit BN math) for correctness check.
# ----------------------------------------------------------------------------
def reference_forward(x_bdg, stages, out_linear, eps=1e-5):
    h = jnp.max(x_bdg.astype(jnp.float32), axis=-1)               # adaptive max pool
    for p in stages:
        h = h @ p["w"].T + p["b"]
        h = p["gamma"] * (h - p["rmean"]) / jnp.sqrt(p["rvar"] + eps) + p["beta"]
        h = jnp.maximum(h, 0.0)
        # nn.Dropout(0.5): identity in eval mode.
    out_w, out_b = out_linear
    return h @ out_w.T + out_b


if __name__ == "__main__":
    # Small shapes consistent with Classifier_Block input [b, d, g].
    B, D, G = 4, 32, 16          # batch, out_channel (< 512 branch -> hidden 128), points
    CLASS_NUM = 10

    key = jax.random.PRNGKey(0)
    kx, kp = jax.random.split(key)
    x = jax.random.normal(kx, (B, D, G), jnp.float32)

    raw_stages, raw_out = build_classifier_raw_params(kp, D, CLASS_NUM)
    ref = reference_forward(x, raw_stages, raw_out)

    # 1) f32 path, default tiling (single G step for this tiny G): strict check.
    hidden_f32, out_f32 = fold_classifier_params(raw_stages, raw_out)
    out = jax.block_until_ready(classifier_block_forward(x, hidden_f32, out_f32))
    assert out.shape == (B, CLASS_NUM)
    assert jnp.allclose(out, ref, atol=1e-3, rtol=1e-3), "f32 mismatch vs reference"

    # 2) f32 path with an explicit small G tile: exercises the multi-step running-max
    #    reduction (pl.when init / finalize) and the batch padding path.
    out_t = jax.block_until_ready(
        classifier_block_forward(x, hidden_f32, out_f32, tile_g=8))
    assert jnp.allclose(out_t, ref, atol=1e-3, rtol=1e-3), "tiled-G mismatch vs reference"

    # 3) bf16-streamed x + bf16 weights (halved HBM bytes, MXU-native dtype); loose
    #    tolerance only accounts for the bf16 rounding vs the f32 reference.
    hidden_bf, out_bf = fold_classifier_params(raw_stages, raw_out,
                                               weight_dtype=jnp.bfloat16)
    out_b16 = jax.block_until_ready(
        classifier_block_forward(x, hidden_bf, out_bf, stream_dtype=jnp.bfloat16))
    assert jnp.allclose(out_b16, ref, atol=1e-1, rtol=1e-1), "bf16 mismatch vs reference"

    # TODO(synk): Dropout is only implemented in eval mode (identity); training-mode
    # stochastic dropout would need pltpu.prng_* inside the kernel.
    print("KERNEL_OK")
</pallas_src>

<mosaic_0001>
module attributes {stable_mosaic.version = 11 : i64} {
  func.func @kernel(%arg0: i32, %arg1: i32, %arg2: memref<8x16x32xf32, #tpu.memory_space<vmem>>, %arg3: memref<32x128xf32, #tpu.memory_space<vmem>>, %arg4: memref<1x128xf32, #tpu.memory_space<vmem>>, %arg5: memref<128x10xf32, #tpu.memory_space<vmem>>, %arg6: memref<1x10xf32, #tpu.memory_space<vmem>>, %arg7: memref<8x10xf32, #tpu.memory_space<vmem>>, %arg8: memref<8x32xf32, #tpu.memory_space<vmem>>) attributes {dimension_semantics = [#tpu.dimension_semantics<parallel>, #tpu.dimension_semantics<arbitrary>], iteration_bounds = array<i64: 1, 1>, scalar_prefetch = 0 : i64, scratch_operands = 1 : i64, tpu.core_type = #tpu.core_type<tc>, window_params = [{transform_indices = @transform_0, window_bounds = array<i64: 8, 16, 32>}, {pipeline_mode = #tpu.pipeline_mode<synchronous>, transform_indices = @transform_1, window_bounds = array<i64: 32, 128>}, {pipeline_mode = #tpu.pipeline_mode<synchronous>, transform_indices = @transform_2, window_bounds = array<i64: 1, 128>}, {pipeline_mode = #tpu.pipeline_mode<synchronous>, transform_indices = @transform_3, window_bounds = array<i64: 128, 10>}, {pipeline_mode = #tpu.pipeline_mode<synchronous>, transform_indices = @transform_4, window_bounds = array<i64: 1, 10>}, {transform_indices = @transform_5, window_bounds = array<i64: 8, 10>}]} {
    %c0_i32 = arith.constant 0 : i32
    %0 = arith.cmpi eq, %arg1, %c0_i32 : i32
    %1 = arith.extui %0 : i1 to i32
    %c0_i32_0 = arith.constant 0 : i32
    %2 = arith.cmpi ne, %1, %c0_i32_0 : i32
    scf.if %2 {
      %cst_9 = arith.constant 0xFF800000 : f32
      %11 = vector.broadcast %cst_9 : f32 to vector<8x32xf32>
      %c0_10 = arith.constant 0 : index
      %c0_11 = arith.constant 0 : index
      %12 = vector.load %arg8[%c0_10, %c0_11] : memref<8x32xf32, #tpu.memory_space<vmem>>, vector<8x32xf32>
      tpu.vector_store %arg8[%c0_10, %c0_11], %11 {strides = array<i32>} : memref<8x32xf32, #tpu.memory_space<vmem>>, vector<8x32xf32>,
    } else {
    }
    %c0 = arith.constant 0 : index
    %c0_1 = arith.constant 0 : index
    %c0_2 = arith.constant 0 : index
    %3 = vector.load %arg2[%c0, %c0_1, %c0_2] : memref<8x16x32xf32, #tpu.memory_space<vmem>>, vector<8x16x32xf32>
    %cst = arith.constant dense<0xFF800000> : vector<8x32xf32>
    %4 = vector.multi_reduction <maximumf>, %3, %cst [1] : vector<8x16x32xf32> to vector<8x32xf32>
    %c0_3 = arith.constant 0 : index
    %c0_4 = arith.constant 0 : index
    %5 = vector.load %arg8[%c0_3, %c0_4] : memref<8x32xf32, #tpu.memory_space<vmem>>, vector<8x32xf32>
    %6 = arith.maximumf %5, %4 : vector<8x32xf32>
    %c0_5 = arith.constant 0 : index
    %c0_6 = arith.constant 0 : index
    %7 = vector.load %arg8[%c0_5, %c0_6] : memref<8x32xf32, #tpu.memory_space<vmem>>, vector<8x32xf32>
    tpu.vector_store %arg8[%c0_5, %c0_6], %6 {strides = array<i32>} : memref<8x32xf32, #tpu.memory_space<vmem>>, vector<8x32xf32>,
    %c0_i32_7 = arith.constant 0 : i32
    %8 = arith.cmpi eq, %arg1, %c0_i32_7 : i32
    %9 = arith.extui %8 : i1 to i32
    %c0_i32_8 = arith.constant 0 : i32
    %10 = arith.cmpi ne, %9, %c0_i32_8 : i32
    scf.if %10 {
      %c0_9 = arith.constant 0 : index
      %c0_10 = arith.constant 0 : index
      %11 = vector.load %arg8[%c0_9, %c0_10] : memref<8x32xf32, #tpu.memory_space<vmem>>, vector<8x32xf32>
      %c0_11 = arith.constant 0 : index
      %c0_12 = arith.constant 0 : index
      %12 = vector.load %arg3[%c0_11, %c0_12] : memref<32x128xf32, #tpu.memory_space<vmem>>, vector<32x128xf32>
      %c0_13 = arith.constant 0 : index
      %c0_14 = arith.constant 0 : index
      %13 = vector.load %arg4[%c0_13, %c0_14] : memref<1x128xf32, #tpu.memory_space<vmem>>, vector<1x128xf32>
      %cst_15 = arith.constant dense<0.000000e+00> : vector<8x128xf32>
      %14 = tpu.matmul %11, %12, %cst_15 {dimension_numbers = #tpu.dot_dimension_numbers<[1], [0], [0], [1], [0, 0, 1, 1], [], []>} : vector<8x32xf32>, vector<32x128xf32>, vector<8x128xf32> -> vector<8x128xf32>
      %15 = vector.broadcast %13 : vector<1x128xf32> to vector<8x128xf32>
      %16 = arith.addf %14, %15 : vector<8x128xf32>
      %cst_16 = arith.constant 0.000000e+00 : f32
      %17 = vector.broadcast %cst_16 : f32 to vector<8x128xf32>
      %18 = arith.maximumf %16, %17 : vector<8x128xf32>
      %c0_17 = arith.constant 0 : index
      %c0_18 = arith.constant 0 : index
      %19 = vector.load %arg5[%c0_17, %c0_18] : memref<128x10xf32, #tpu.memory_space<vmem>>, vector<128x10xf32>
      %c0_19 = arith.constant 0 : index
      %c0_20 = arith.constant 0 : index
      %20 = vector.load %arg6[%c0_19, %c0_20] : memref<1x10xf32, #tpu.memory_space<vmem>>, vector<1x10xf32>
      %cst_21 = arith.constant dense<0.000000e+00> : vector<8x10xf32>
      %21 = tpu.matmul %18, %19, %cst_21 {dimension_numbers = #tpu.dot_dimension_numbers<[1], [0], [0], [1], [0, 0, 1, 1], [], []>} : vector<8x128xf32>, vector<128x10xf32>, vector<8x10xf32> -> vector<8x10xf32>
      %22 = vector.broadcast %20 : vector<1x10xf32> to vector<8x10xf32>
      %23 = arith.addf %21, %22 : vector<8x10xf32>
      %c0_22 = arith.constant 0 : index
      %c0_23 = arith.constant 0 : index
      %24 = vector.load %arg7[%c0_22, %c0_23] : memref<8x10xf32, #tpu.memory_space<vmem>>, vector<8x10xf32>
      tpu.vector_store %arg7[%c0_22, %c0_23], %23 {strides = array<i32>} : memref<8x10xf32, #tpu.memory_space<vmem>>, vector<8x10xf32>,
    } else {
    }
    return
  }
  func.func @transform_0(%arg0: i32, %arg1: i32) -> (i32, i32, i32) {
    %c0_i32 = arith.constant 0 : i32
    %c0_i32_0 = arith.constant 0 : i32
    return %arg0, %arg1, %c0_i32 : i32, i32, i32
  }
  func.func @transform_1(%arg0: i32, %arg1: i32) -> (i32, i32) {
    %c0_i32 = arith.constant 0 : i32
    %c0_i32_0 = arith.constant 0 : i32
    %c0_i32_1 = arith.constant 0 : i32
    return %c0_i32, %c0_i32_0 : i32, i32
  }
  func.func @transform_2(%arg0: i32, %arg1: i32) -> (i32, i32) {
    %c0_i32 = arith.constant 0 : i32
    %c0_i32_0 = arith.constant 0 : i32
    %c0_i32_1 = arith.constant 0 : i32
    return %c0_i32, %c0_i32_0 : i32, i32
  }
  func.func @transform_3(%arg0: i32, %arg1: i32) -> (i32, i32) {
    %c0_i32 = arith.constant 0 : i32
    %c0_i32_0 = arith.constant 0 : i32
    %c0_i32_1 = arith.constant 0 : i32
    return %c0_i32, %c0_i32_0 : i32, i32
  }
  func.func @transform_4(%arg0: i32, %arg1: i32) -> (i32, i32) {
    %c0_i32 = arith.constant 0 : i32
    %c0_i32_0 = arith.constant 0 : i32
    %c0_i32_1 = arith.constant 0 : i32
    return %c0_i32, %c0_i32_0 : i32, i32
  }
  func.func @transform_5(%arg0: i32, %arg1: i32) -> (i32, i32) {
    %c0_i32 = arith.constant 0 : i32
    %c0_i32_0 = arith.constant 0 : i32
    return %arg0, %c0_i32 : i32, i32
  }
}

</mosaic_0001>

<bundles_post_ra>
// kernel: tpu_custom_call.1
= control target key start
LH: loop header
LB: loop body
LE: loop exit
PB: predicated region body
PF: predicated region fallthrough
CT: control target
= control target key end

     0   :  { %10 = vsyncpa [#allocation4], 0  ;;  %s667_s0 = inlined_call_operand.vmem [shape: f32[8,16,32], index: 0, kind: input, shape index: {}]   ;;  %s668_s1 = inlined_call_operand.hbm [shape: f32[32,128], index: 1, kind: input, shape index: {}]   ;;  %s669_s2 = inlined_call_operand.vmem [shape: f32[1,128], index: 2, kind: input, shape index: {}]   ;;  %s670_s3 = inlined_call_operand.vmem [shape: f32[128,10], index: 3, kind: input, shape index: {}]   ;;  %s671_s4 = inlined_call_operand.vmem [shape: f32[1,10], index: 4, kind: input, shape index: {}]   ;;  %s672_s5 = inlined_call_operand.hbm [shape: f32[8,10], index: 5, kind: output, shape index: {}]  }
   0x1   :  { %11 = vsyncpa [#allocation5], 0  ;;  %s477_s18 = smov [#allocation3]  }
   0x2   :  { %s19_s19 = sshll.u32 %s477_s18, 4  ;;  %s20_s19 = int_to_ptr.vmem [resolvable:$true] %s19_s19 }
   0x3   :  { %s441_s20 = scalar_lea.vmem %s20_s19, 512  ;;  %p446_p1 = scmp.lt.s32.totalorder %s20_s19, %s20_s19 }
   0x4   :  { %p442_p0 = scmp.ne.s32.totalorder %s20_s19, %s441_s20  ;;  %p447_p2 = scmp.lt.s32.totalorder %s441_s20, %s441_s20 }
   0x6   :  { %p448_p3 = por %p447_p2, %p446_p1 }
   0x8   :  { %p449_p4 = pnand %p448_p3, %p442_p0 }
   0xa   :  { %452 = shalt.err (!%p449_p4)
}
   0xb   :  { %s478_s21 = smov 128   ;;  %s479_s22 = smov 8  }
   0xc   :  { %25 = dma.hbm_to_vmem [thread:$0]  %s668_s1, 512, %s20_s19, [#allocation4], %s478_s21, %s478_s21, %s479_s22  }
   0xd   :  { %473 = dma.done.wait [#allocation4], 512  }
   0xe   :  { %474 = vsyncadd [#allocation4], 4294966784  ;;  %vm39_vm0 = vcmask 261120   ;;  %v480_v0 = vmov 0.0   ;;  %vm481_vm1 = vmmov 0   ;;  %v482_v1 = vmov -inf  }
   0xf   :  { %380 = vmatprep.subr.mxu0 %v480_v0  ;;  %388 = vmatprep.mubr.msk.f32.mxu0 %vm481_vm1, %v480_v0  ;;  %40 = vst.msk [vmem:[#allocation2] sm:$0xff] %vm39_vm0, %v482_v1  ;;  %v163_v2 = vld [vmem:[#allocation3 + $0x18] sm:$0xff]  ;;  %v162_v3 = vld [vmem:[#allocation3 + $0x10] sm:$0xff]  ;;  %v161_v4 = vld [vmem:[#allocation3 + $0x8] sm:$0xff]  ;;  %vm139_vm2 = vcmask 1041409   ;;  %vm141_vm3 = vcmask 1042434  }
  0x10   :  { %391 = vmatprep.subr.mxu1 %v480_v0  ;;  %423 = vmatprep.mubr.msk.f32.mxu1 %vm481_vm1, %v480_v0  ;;  %v41_v5 = vld [vmem:[%s667_s0] sm:$0xff]  ;;  %v42_v6 = vld [vmem:[%s667_s0 + $0x8] sm:$0xff]  ;;  %v43_v8 = vld [vmem:[%s667_s0 + $0x10] sm:$0xff]  ;;  %vm143_vm4 = vcmask 1043459   ;;  %vm145_vm5 = vcmask 1044484   ;;  %vm147_vm6 = vcmask 1045509  }
  0x11   :  { %381 = vmatpush3.msra.mxu0 %v163_v2  ;;  %v160_v7 = vld [vmem:[#allocation3] sm:$0xff]  ;;  %v44_v9 = vld [vmem:[%s667_s0 + $0x18] sm:$0xff]  ;;  %v45_v10 = vld [vmem:[%s667_s0 + $0x20] sm:$0xff]  ;;  %v58_v11 = vsel %vm39_vm0, %v41_v5, -inf  ;;  %v59_v12 = vsel %vm39_vm0, %v42_v6, -inf  ;;  %v67_v17 = vsel %vm39_vm0, %v43_v8, -inf }
  0x12   :  { %382 = vmatprep.subr.mxu0 %v480_v0  ;;  %v46_v13 = vld [vmem:[%s667_s0 + $0x28] sm:$0xff]  ;;  %v47_v14 = vld [vmem:[%s667_s0 + $0x30] sm:$0xff]  ;;  %v48_v15 = vld [vmem:[%s667_s0 + $0x38] sm:$0xff]  ;;  %v60_v16 = vmax.f32 %v58_v11, %v59_v12  ;;  %v68_v18 = vsel %vm39_vm0, %v44_v9, -inf  ;;  %v76_v19 = vsel %vm39_vm0, %v45_v10, -inf  ;;  %vm149_vm7 = vcmask 1046534  }
  0x13   :  { %383 = vmatpush3.msra.mxu0 %v162_v3  ;;  %v49_v20 = vld [vmem:[%s667_s0 + $0x40] sm:$0xff]  ;;  %v50_v21 = vld [vmem:[%s667_s0 + $0x48] sm:$0xff]  ;;  %v51_v22 = vld [vmem:[%s667_s0 + $0x50] sm:$0xff]  ;;  %v69_v23 = vmax.f32 %v67_v17, %v68_v18  ;;  %v77_v24 = vsel %vm39_vm0, %v46_v13, -inf  ;;  %v85_v25 = vsel %vm39_vm0, %v47_v14, -inf  ;;  %v86_v26 = vsel %vm39_vm0, %v48_v15, -inf }
  0x14   :  { %384 = vmatprep.subr.mxu0 %v480_v0  ;;  %v52_v27 = vld [vmem:[%s667_s0 + $0x58] sm:$0xff]  ;;  %v53_v28 = vld [vmem:[%s667_s0 + $0x60] sm:$0xff]  ;;  %v54_v29 = vld [vmem:[%s667_s0 + $0x68] sm:$0xff]  ;;  %v61_v30 = vrot.slane %v60_v16, 4  ;;  %v78_v31 = vmax.f32 %v76_v19, %v77_v24  ;;  %v87_v32 = vmax.f32 %v85_v25, %v86_v26  ;;  %v94_v33 = vsel %vm39_vm0, %v49_v20, -inf  ;;  %s483_s13 = smov [#allocation6]  }
  0x15   :  { %385 = vmatpush3.msra.mxu0 %v161_v4  ;;  %v70_v34 = vrot.slane %v69_v23, 4  ;;  %v95_v35 = vsel %vm39_vm0, %v50_v21, -inf  ;;  %v103_v36 = vsel %vm39_vm0, %v51_v22, -inf  ;;  %v104_v37 = vsel %vm39_vm0, %v52_v27, -inf  ;;  %v55_v38 = vld [vmem:[%s667_s0 + $0x70] sm:$0xff]  ;;  %v260_v43 = vld [vmem:[%s670_s3 + $0x78] sm:$0xff] }
  0x16   :  { %386 = vmatprep.subr.mxu0 %v480_v0  ;;  %v62_v39 = vmax.f32 %v60_v16, %v61_v30  ;;  %v79_v40 = vrot.slane %v78_v31, 4  ;;  %v88_v41 = vrot.slane %v87_v32, 4  ;;  %v96_v42 = vmax.f32 %v94_v33, %v95_v35  ;;  %v259_v44 = vld [vmem:[%s670_s3 + $0x70] sm:$0xff]  ;;  %392 = vmatpush3.msra.mxu1 %v260_v43  ;;  %v56_v49 = vld [vmem:[%s667_s0 + $0x78] sm:$0xff]  ;;  %v258_v54 = vld [vmem:[%s670_s3 + $0x68] sm:$0xff]  ;;  %s346_s14 = sshll.u32 %s483_s13, 4  ;;  %s347_s14 = int_to_ptr.vmem [resolvable:$true] %s346_s14 }
  0x17   :  { %387 = vmatpush3.msra.mxu0 %v160_v7  ;;  %v71_v45 = vmax.f32 %v69_v23, %v70_v34  ;;  %v105_v46 = vmax.f32 %v103_v36, %v104_v37  ;;  %v112_v47 = vsel %vm39_vm0, %v53_v28, -inf  ;;  %v113_v48 = vsel %vm39_vm0, %v54_v29, -inf  ;;  %393 = vmatprep.subr.mxu1 %v480_v0  ;;  %v257_v63 = vld [vmem:[%s670_s3 + $0x60] sm:$0xff]  ;;  %v256_v9 = vld [vmem:[%s670_s3 + $0x58] sm:$0xff]  ;;  %v255_v18 = vld [vmem:[%s670_s3 + $0x50] sm:$0xff]  ;;  %p458_p6 = scmp.lt.s32.totalorder %s347_s14, %s347_s14 }
  0x18   :  { %v63_v50 = vrot.slane %v62_v39, 2  ;;  %v80_v51 = vmax.f32 %v78_v31, %v79_v40  ;;  %v89_v52 = vmax.f32 %v87_v32, %v88_v41  ;;  %v97_v53 = vrot.slane %v96_v42, 4  ;;  %394 = vmatpush3.msra.mxu1 %v259_v44  ;;  %v254_v26 = vld [vmem:[%s670_s3 + $0x48] sm:$0xff]  ;;  %v253_v33 = vld [vmem:[%s670_s3 + $0x40] sm:$0xff]  ;;  %v251_v43 = vld [vmem:[%s670_s3 + $0x30] sm:$0xff] }
  0x19   :  { %v72_v55 = vrot.slane %v71_v45, 2  ;;  %v106_v56 = vrot.slane %v105_v46, 4  ;;  %v114_v57 = vmax.f32 %v112_v47, %v113_v48  ;;  %v121_v58 = vsel %vm39_vm0, %v55_v38, -inf  ;;  %395 = vmatprep.subr.mxu1 %v480_v0  ;;  %v130_v48 = vld [vmem:[#allocation2] sm:$0xff] }
  0x1a   :  { %v64_v59 = vmax.f32 %v62_v39, %v63_v50  ;;  %v81_v60 = vrot.slane %v80_v51, 2  ;;  %v90_v61 = vrot.slane %v89_v52, 2  ;;  %v98_v62 = vmax.f32 %v96_v42, %v97_v53  ;;  %396 = vmatpush3.msra.mxu1 %v258_v54  ;;  %v252_v39 = vld [vmem:[%s670_s3 + $0x38] sm:$0xff]  ;;  %v247_v54 = vld [vmem:[%s670_s3 + $0x10] sm:$0xff] }
  0x1b   :  { %v73_v1 = vmax.f32 %v71_v45, %v72_v55  ;;  %v107_v2 = vmax.f32 %v105_v46, %v106_v56  ;;  %v115_v3 = vrot.slane %v114_v57, 4  ;;  %v122_v4 = vsel %vm39_vm0, %v56_v49, -inf  ;;  %397 = vmatprep.subr.mxu1 %v480_v0  ;;  %v250_v46 = vld [vmem:[%s670_s3 + $0x28] sm:$0xff]  ;;  %v249_v49 = vld [vmem:[%s670_s3 + $0x20] sm:$0xff] }
  0x1c   :  { %v65_v5 = vrot.slane %v64_v59, 1  ;;  %v82_v6 = vmax.f32 %v80_v51, %v81_v60  ;;  %v91_v7 = vmax.f32 %v89_v52, %v90_v61  ;;  %v99_v8 = vrot.slane %v98_v62, 2  ;;  %398 = vmatpush3.msra.mxu1 %v257_v63  ;;  %v248_v52 = vld [vmem:[%s670_s3 + $0x18] sm:$0xff]  ;;  %v246_v55 = vld [vmem:[%s670_s3 + $0x8] sm:$0xff]  ;;  %v245_v56 = vld [vmem:[%s670_s3] sm:$0xff]  ;;  %s453_s3 = scalar_lea.vmem %s347_s14, 128 }
  0x1d   :  { %v74_v10 = vrot.slane %v73_v1, 1  ;;  %v108_v11 = vrot.slane %v107_v2, 2  ;;  %v116_v12 = vmax.f32 %v114_v57, %v115_v3  ;;  %v123_v13 = vmax.f32 %v121_v58, %v122_v4  ;;  %399 = vmatprep.subr.mxu1 %v480_v0  ;;  %v355_v57 = vld [vmem:[%s669_s2] ss:$0 sm:$0xff]  ;;  %p454_p5 = scmp.ne.s32.totalorder %s347_s14, %s453_s3  ;;  %p459_p7 = scmp.lt.s32.totalorder %s453_s3, %s453_s3 }
  0x1e   :  { %v66_v14 = vmax.f32 %v64_v59, %v65_v5  ;;  %v83_v15 = vrot.slane %v82_v6, 1  ;;  %v92_v16 = vrot.slane %v91_v7, 1  ;;  %v100_v17 = vmax.f32 %v98_v62, %v99_v8  ;;  %400 = vmatpush3.msra.mxu1 %v256_v9  ;;  %v357_v62 = vld [vmem:[%s671_s4] ss:$0 sm:$0xff] }
  0x1f   :  { %v75_v19 = vmax.f32 %v73_v1, %v74_v10  ;;  %v109_v20 = vmax.f32 %v107_v2, %v108_v11  ;;  %v117_v21 = vrot.slane %v116_v12, 2  ;;  %v124_v22 = vrot.slane %v123_v13, 4  ;;  %401 = vmatprep.subr.mxu1 %v480_v0  ;;  %p460_p8 = por %p459_p7, %p458_p6 }
  0x20   :  { %v84_v23 = vmax.f32 %v82_v6, %v83_v15  ;;  %v93_v24 = vmax.f32 %v91_v7, %v92_v16  ;;  %v101_v25 = vrot.slane %v100_v17, 1  ;;  %402 = vmatpush3.msra.mxu1 %v255_v18  ;;  %vm151_vm8 = vcmask 1047559  }
  0x21   :  { %v110_v27 = vrot.slane %v109_v20, 1  ;;  %v118_v28 = vmax.f32 %v116_v12, %v117_v21  ;;  %v125_v29 = vmax.f32 %v123_v13, %v124_v22  ;;  %v140_v30 = vsel %vm139_vm2, %v75_v19, %v66_v14  ;;  %403 = vmatprep.subr.mxu1 %v480_v0  ;;  %p461_p9 = pnand %p460_p8, %p454_p5 }
  0x22   :  { %v102_v31 = vmax.f32 %v100_v17, %v101_v25  ;;  %v142_v32 = vsel %vm141_vm3, %v84_v23, %v140_v30  ;;  %404 = vmatpush3.msra.mxu1 %v254_v26  ;;  %vm338_vm9 = vcmask 80896  }
  0x23   :  { %v111_v34 = vmax.f32 %v109_v20, %v110_v27  ;;  %v119_v35 = vrot.slane %v118_v28, 1  ;;  %v126_v36 = vrot.slane %v125_v29, 2  ;;  %v144_v37 = vsel %vm143_vm4, %v93_v24, %v142_v32  ;;  %405 = vmatprep.subr.mxu1 %v480_v0 }
  0x24   :  { %v146_v38 = vsel %vm145_vm5, %v102_v31, %v144_v37  ;;  %406 = vmatpush3.msra.mxu1 %v253_v33 }
  0x25   :  { %v120_v40 = vmax.f32 %v118_v28, %v119_v35  ;;  %v127_v41 = vmax.f32 %v125_v29, %v126_v36  ;;  %v148_v42 = vsel %vm147_vm6, %v111_v34, %v146_v38  ;;  %407 = vmatprep.subr.mxu1 %v480_v0 }
  0x26   :  { %408 = vmatpush3.msra.mxu1 %v252_v39 }
  0x27   :  { %v128_v44 = vrot.slane %v127_v41, 1  ;;  %v150_v45 = vsel %vm149_vm7, %v120_v40, %v148_v42  ;;  %409 = vmatprep.subr.mxu1 %v480_v0 }
  0x28   :  { %410 = vmatpush3.msra.mxu1 %v251_v43 }
  0x29   :  { %v129_v47 = vmax.f32 %v127_v41, %v128_v44  ;;  %411 = vmatprep.subr.mxu1 %v480_v0 }
  0x2a   :  { %412 = vmatpush3.msra.mxu1 %v250_v46 }
  0x2b   :  { %v152_v50 = vsel %vm151_vm8, %v129_v47, %v150_v45  ;;  %413 = vmatprep.subr.mxu1 %v480_v0 }
  0x2c   :  { %v154_v51 = vmax.f32 %v130_v48, %v152_v50  ;;  %414 = vmatpush3.msra.mxu1 %v249_v49 }
  0x2d   :  { %415 = vmatprep.subr.mxu1 %v480_v0 }
  0x2e   :  { %155 = vst.msk [vmem:[#allocation2] sm:$0xff] %vm39_vm0, %v154_v51  ;;  %416 = vmatpush3.msra.mxu1 %v248_v52 }
  0x2f   :  { %417 = vmatprep.subr.mxu1 %v480_v0 }
  0x30   :  { %418 = vmatpush3.msra.mxu1 %v247_v54 }
  0x31   :  { %419 = vmatprep.subr.mxu1 %v480_v0 }
  0x32   :  { %420 = vmatpush3.msra.mxu1 %v246_v55 }
  0x33   :  { %421 = vmatprep.subr.mxu1 %v480_v0 }
  0x34   :  { %422 = vmatpush3.msra.mxu1 %v245_v56 }
  0x35   :  { %v159_v53 = vld [vmem:[#allocation2] sm:$0xff] }
  0x36   :  { %389 = vmatmul.mubr.msk.f32.vlgmr.msra.gmra.mxu0 %vm39_vm0, %v159_v53 }
  0xf6   :  { %v240_v58 = vpop.f32.mrf.mxu0 }
  0xf7   :  { %v241_v59 = vadd.f32 %v355_v57, %v240_v58 }
  0xf8   :  { %v390_v60 = vpop.f32.mrf.mxu0 }
  0xf9   :  { %v244_v61 = vmax.f32 %v241_v59, 0.0 }
  0xfb   :  { %424 = vmatmul.mubr.f32.vlgmr.msra.gmra.mxu1 %v244_v61 }
 0x1bb   :  { %v334_v0 = vpop.f32.mrf.mxu1 }
 0x1bc   :  { %v335_v63 = vadd.f32 %v357_v62, %v334_v0 }
 0x1bd   :  { %v425_v1 = vpop.f32.mrf.mxu1 }
 0x1be   :  { %339 = vst.msk [vmem:[#allocation6] sm:$0xff] %vm338_vm9, %v335_v63 }
 0x1bf   :  { %464 = shalt.err (!%p461_p9)
}
 0x1c0   :  { %349 = dma.vmem_to_hbm [thread:$0]  %s347_s14, 128, %s672_s5, [#allocation5]  }
 0x1c1   :  { %475 = dma.done.wait [#allocation5], 128  }
 0x1c2   :  { %476 = vsyncadd [#allocation5], 4294967168 }
 0x1c3   :  { %353 = vsyncpa [#allocation4], 1 }
 0x1c4   :  { %354 = vsyncpa [#allocation5], 1 }

</bundles_post_ra>
